<compile_context>
chip_gen: v7x
topology: tpu7x:2x2x1
jax: 0.10.0
libtpu: 0.0.40
codegen_flags: <defaults>
</compile_context>

<pallas_src>
import functools
import math

import jax
import jax.numpy as jnp
from jax import lax
from jax.experimental import pallas as pl
from jax.experimental.pallas import tpu as pltpu


def _round_up(x, m):
    return (x + m - 1) // m * m


def _vmem_limit_bytes():
    """Generation-aware scoped-VMEM limit: ~half of physical, capped at 64 MiB
    (v7x: 64 MiB physical -> 32 MiB limit; v5e/v6e: 128 MiB -> 64 MiB)."""
    cap = 128 * 1024 * 1024
    try:
        cap = int(getattr(pltpu.get_tpu_info(), "vmem_capacity_bytes", cap))
    except Exception:
        cap = 64 * 1024 * 1024
    return max(16 * 1024 * 1024, min(cap // 2, 64 * 1024 * 1024))


def _pick_tile_s(seq_len, batch, per_row_bytes, budget_bytes):
    """Largest legal sequence tile fitting the VMEM budget.

    Legal tiles divide seq_len and are multiples of 8 (or the full sequence).
    Prefers tiles that give >= 2 grid steps (megacore / output pipelining);
    if nothing fits the budget, clamps to the smallest legal tile.
    """
    cands = sorted({t for t in range(8, seq_len + 1, 8) if seq_len % t == 0}
                   | {seq_len})
    fits = [t for t in cands if t * batch * per_row_bytes <= budget_bytes]
    if not fits:
        return cands[0]
    multi = [t for t in fits if seq_len // t >= 2]
    return max(multi) if multi else max(fits)


def _pe_rows(pe_tile, tile_s, batch):
    """Expand (tile_s, D) positional encodings to flat (tile_s*batch, D) rows
    (row r -> pe_tile[r // batch]) via a binary position-one-hot matmul on the
    MXU.  Avoids materializing a broadcast + relayout on the VPU/XLU."""
    tile_rows = tile_s * batch
    r_idx = lax.broadcasted_iota(jnp.int32, (tile_rows, tile_s), 0)
    s_idx = lax.broadcasted_iota(jnp.int32, (tile_rows, tile_s), 1)
    off = r_idx - s_idx * batch                      # r - s*B in [0, B) iff s == r//B
    pos_onehot = jnp.where((off >= 0) & (off < batch), 1.0, 0.0)
    pos_onehot = pos_onehot.astype(pe_tile.dtype)
    return jnp.dot(pos_onehot, pe_tile, preferred_element_type=jnp.float32)


# --------------------------------------------------------------------------
# Path A: VMEM-resident table, one-hot MXU gather (small vocabularies).
# --------------------------------------------------------------------------
def _onehot_embed_kernel(ids_ref,     # VMEM (tile_rows, 1) int32
                         table_ref,   # VMEM (Vpad, D) -- resident across grid
                         pe_ref,      # VMEM (tile_s, D)
                         out_ref,     # VMEM (tile_rows, D)
                         *, scale, tile_s, batch):
    tile_rows = tile_s * batch
    vpad = table_ref.shape[0]

    ids = ids_ref[...]                                            # (tile_rows, 1)
    tok_iota = lax.broadcasted_iota(jnp.int32, (tile_rows, vpad), 1)
    onehot = jnp.where(ids == tok_iota, 1.0, 0.0).astype(table_ref.dtype)
    # Binary one-hot -> exact row gather; scale applied afterwards on the VPU.
    emb = jnp.dot(onehot, table_ref[...], preferred_element_type=jnp.float32)

    pe_rows = _pe_rows(pe_ref[...], tile_s, batch)
    out_ref[...] = (emb * scale + pe_rows).astype(out_ref.dtype)


# --------------------------------------------------------------------------
# Path B: HBM-resident table, per-row DMA gather with aggregate drain.
# --------------------------------------------------------------------------
def _gather_embed_kernel(ids_ref,     # SMEM (S*B,) int32 (scalar prefetch)
                         table_ref,   # HBM  (V, D) (memory_space=pl.ANY)
                         pe_ref,      # VMEM (tile_s, D)
                         out_ref,     # VMEM (tile_rows, D)
                         buf_ref,     # VMEM scratch (tile_rows, D)
                         sem_ref,     # DMA semaphore
                         *, scale, tile_s, batch):
    tile_rows = tile_s * batch
    base = pl.program_id(0) * tile_rows

    # Issue one row-gather DMA per token of this block; every copy signals the
    # same semaphore, so completion is drained with a single aggregate wait.
    @pl.loop(0, tile_rows)
    def _(r):
        tok = ids_ref[base + r]
        pltpu.make_async_copy(
            table_ref.at[pl.ds(tok, 1), :],
            buf_ref.at[pl.ds(r, 1), :],
            sem_ref,
        ).start()

    # Aggregate drain: wait-only descriptor -- only the destination byte count
    # and the semaphore matter, and buf_ref's size equals the sum of all the
    # row copies issued above.  Replaces tile_rows per-row waits + SMEM reads.
    pltpu.make_async_copy(buf_ref, buf_ref, sem_ref).wait()

    pe_rows = _pe_rows(pe_ref[...], tile_s, batch)
    out_ref[...] = (buf_ref[...] * scale + pe_rows).astype(out_ref.dtype)
    # TODO(synk): double-buffer buf_ref/sem across grid steps (issue step i+1's
    # row copies while computing step i) to hide gather issue/DMA latency.


# --------------------------------------------------------------------------
# Wrapper / dispatch.
# --------------------------------------------------------------------------
def embeddings_with_learned_pe(x, table, pe, *, tile_s=None, force_gather=False):
    """x: (S, B) int32; table: (V, D); pe: (max_len, 1, D) or (max_len, D).
    Returns (S, B, D) = table[x] * sqrt(D) + pe[:S]."""
    S, B = x.shape
    V, D = table.shape
    scale = math.sqrt(D)
    out_dtype = jnp.promote_types(table.dtype, pe.dtype)
    pe2d = pe.reshape(pe.shape[0], D)[:S]            # (S, D), == module's pe[:x.shape[0]]

    vmem_limit = _vmem_limit_bytes()
    elt = jnp.dtype(table.dtype).itemsize
    v_pad = _round_up(V, 128)
    table_bytes = v_pad * D * elt
    # Small-vocab fast path: table kept VMEM-resident across the grid.
    table_budget = min(16 * 1024 * 1024, vmem_limit // 4)   # ~8 MiB on v7x, 16 MiB on v5e/v6e
    use_onehot = (not force_gather) and table_bytes <= table_budget and v_pad <= 8192

    if tile_s is not None:
        assert S % tile_s == 0 and (tile_s % 8 == 0 or tile_s == S), \
            "tile_s must divide seq_len and be a multiple of 8 (or equal seq_len)"

    if use_onehot:
        # per-row live bytes: out(x2) + emb + pe_rows temps + one-hot row + ids
        per_row = 4 * elt * D + 4 * v_pad + 8
        budget = max(vmem_limit // 2 - 2 * table_bytes, 256 * 1024)
        ts = tile_s if tile_s is not None else _pick_tile_s(S, B, per_row, budget)
        tile_rows = ts * B

        table_p = table if v_pad == V else jnp.pad(table, ((0, v_pad - V), (0, 0)))
        ids_col = x.reshape(S * B, 1).astype(jnp.int32)

        kernel = functools.partial(_onehot_embed_kernel,
                                   scale=scale, tile_s=ts, batch=B)
        out_flat = pl.pallas_call(
            kernel,
            out_shape=jax.ShapeDtypeStruct((S * B, D), out_dtype),
            grid_spec=pltpu.PrefetchScalarGridSpec(
                num_scalar_prefetch=0,
                grid=(S // ts,),
                in_specs=[
                    pl.BlockSpec((tile_rows, 1), lambda i: (i, 0)),   # token ids
                    pl.BlockSpec((v_pad, D), lambda i: (0, 0)),       # resident table
                    pl.BlockSpec((ts, D), lambda i: (i, 0)),          # pe tile
                ],
                out_specs=pl.BlockSpec((tile_rows, D), lambda i: (i, 0)),
            ),
            compiler_params=pltpu.CompilerParams(
                dimension_semantics=("parallel",),
                vmem_limit_bytes=vmem_limit,
            ),
            cost_estimate=pl.CostEstimate(
                flops=2 * S * B * D * (v_pad + ts),
                transcendentals=0,
                bytes_accessed=table_bytes + S * D * elt + S * B * D * elt + S * B * 4,
            ),
        )(ids_col, table_p, pe2d)
    else:
        # per-row live bytes: out(x2) + staging + pe_rows temp + slack
        per_row = 5 * elt * D
        ts = tile_s if tile_s is not None else _pick_tile_s(S, B, per_row,
                                                            vmem_limit // 2)
        tile_rows = ts * B
        ids_flat = x.reshape(S * B).astype(jnp.int32)

        kernel = functools.partial(_gather_embed_kernel,
                                   scale=scale, tile_s=ts, batch=B)
        out_flat = pl.pallas_call(
            kernel,
            out_shape=jax.ShapeDtypeStruct((S * B, D), out_dtype),
            grid_spec=pltpu.PrefetchScalarGridSpec(
                num_scalar_prefetch=1,
                grid=(S // ts,),
                in_specs=[
                    pl.BlockSpec(memory_space=pl.ANY),                # table stays in HBM
                    pl.BlockSpec((ts, D), lambda i, ids: (i, 0)),     # pe tile
                ],
                out_specs=pl.BlockSpec((tile_rows, D), lambda i, ids: (i, 0)),
                scratch_shapes=[
                    pltpu.VMEM((tile_rows, D), table.dtype),          # gather staging
                    pltpu.SemaphoreType.DMA(()),
                ],
            ),
            compiler_params=pltpu.CompilerParams(
                dimension_semantics=("parallel",),
                vmem_limit_bytes=vmem_limit,
            ),
            cost_estimate=pl.CostEstimate(
                flops=2 * S * B * D * (1 + ts),
                transcendentals=0,
                bytes_accessed=2 * S * B * D * elt + S * D * elt + S * B * 4,
            ),
        )(ids_flat, table, pe2d)

    return out_flat.reshape(S, B, D)


if __name__ == "__main__":
    key = jax.random.PRNGKey(0)
    d_model, n_vocab, max_len = 128, 1000, 64
    seq_len, batch = 16, 2

    k1, k2, k3 = jax.random.split(key, 3)
    # Synthetic parameters, rounded to bf16-representable f32 values so the
    # one-hot MXU gather path matches the f32 reference exactly regardless of
    # the MXU's matmul-input rounding mode (the one-hot itself is binary and
    # the sqrt(d_model) scale is applied post-matmul in f32).
    table = jax.random.normal(k1, (n_vocab, d_model), dtype=jnp.float32)
    table = table.astype(jnp.bfloat16).astype(jnp.float32)
    pe = 0.02 * jax.random.normal(k2, (max_len, 1, d_model), dtype=jnp.float32)
    pe = pe.astype(jnp.bfloat16).astype(jnp.float32)
    x = jax.random.randint(k3, (seq_len, batch), 0, n_vocab, dtype=jnp.int32)

    # Pure-JAX reference of the PyTorch forward pass.
    ref = jnp.take(table, x, axis=0) * math.sqrt(d_model) + pe[:seq_len]

    # Default dispatch: small vocab -> VMEM-resident table, one-hot MXU gather,
    # multi-step "parallel" grid (tile_s = 8 here).
    out_a = jax.block_until_ready(embeddings_with_learned_pe(x, table, pe))
    assert out_a.shape == (seq_len, batch, d_model)
    assert jnp.allclose(out_a, ref, atol=1e-5, rtol=1e-5), \
        float(jnp.max(jnp.abs(out_a - ref)))

    # Forced large-table code path: per-row HBM DMA gather with a single
    # aggregate drain.
    out_b = jax.block_until_ready(
        embeddings_with_learned_pe(x, table, pe, force_gather=True))
    assert jnp.allclose(out_b, ref, atol=1e-5, rtol=1e-5), \
        float(jnp.max(jnp.abs(out_b - ref)))

    print("KERNEL_OK")
</pallas_src>

<mosaic_0001>
module attributes {stable_mosaic.version = 11 : i64} {
  func.func @_onehot_embed_kernel(%arg0: i32, %arg1: memref<16x1xi32, #tpu.memory_space<vmem>>, %arg2: memref<1024x128xf32, #tpu.memory_space<vmem>>, %arg3: memref<8x128xf32, #tpu.memory_space<vmem>>, %arg4: memref<16x128xf32, #tpu.memory_space<vmem>>) attributes {dimension_semantics = [#tpu.dimension_semantics<parallel>], iteration_bounds = array<i64: 2>, scalar_prefetch = 0 : i64, scratch_operands = 0 : i64, tpu.core_type = #tpu.core_type<tc>, window_params = [{transform_indices = @transform_0, window_bounds = array<i64: 16, 1>}, {pipeline_mode = #tpu.pipeline_mode<synchronous>, transform_indices = @transform_1, window_bounds = array<i64: 1024, 128>}, {transform_indices = @transform_2, window_bounds = array<i64: 8, 128>}, {transform_indices = @transform_3, window_bounds = array<i64: 16, 128>}]} {
    %c0 = arith.constant 0 : index
    %c0_0 = arith.constant 0 : index
    %0 = vector.load %arg1[%c0, %c0_0] : memref<16x1xi32, #tpu.memory_space<vmem>>, vector<16x1xi32>
    %1 = tpu.iota {dimensions = array<i32: 1>} : vector<16x1024xi32>
    %2 = vector.broadcast %0 : vector<16x1xi32> to vector<16x1024xi32>
    %3 = arith.cmpi eq, %2, %1 : vector<16x1024xi32>
    %cst = arith.constant 1.000000e+00 : f32
    %cst_1 = arith.constant 0.000000e+00 : f32
    %4 = vector.broadcast %cst : f32 to vector<16x1024xf32>
    %5 = vector.broadcast %cst_1 : f32 to vector<16x1024xf32>
    %6 = arith.select %3, %4, %5 : vector<16x1024xi1>, vector<16x1024xf32>
    %c0_2 = arith.constant 0 : index
    %c0_3 = arith.constant 0 : index
    %7 = vector.load %arg2[%c0_2, %c0_3] : memref<1024x128xf32, #tpu.memory_space<vmem>>, vector<1024x128xf32>
    %cst_4 = arith.constant dense<0.000000e+00> : vector<16x128xf32>
    %8 = tpu.matmul %6, %7, %cst_4 {dimension_numbers = #tpu.dot_dimension_numbers<[1], [0], [0], [1], [0, 0, 1, 1], [], []>} : vector<16x1024xf32>, vector<1024x128xf32>, vector<16x128xf32> -> vector<16x128xf32>
    %c0_5 = arith.constant 0 : index
    %c0_6 = arith.constant 0 : index
    %9 = vector.load %arg3[%c0_5, %c0_6] : memref<8x128xf32, #tpu.memory_space<vmem>>, vector<8x128xf32>
    %10 = tpu.iota {dimensions = array<i32: 0>} : vector<16x8xi32>
    %11 = tpu.iota {dimensions = array<i32: 1>} : vector<16x8xi32>
    %c2_i32 = arith.constant 2 : i32
    %12 = vector.broadcast %c2_i32 : i32 to vector<16x8xi32>
    %13 = arith.muli %11, %12 : vector<16x8xi32>
    %14 = arith.subi %10, %13 : vector<16x8xi32>
    %c0_i32 = arith.constant 0 : i32
    %15 = vector.broadcast %c0_i32 : i32 to vector<16x8xi32>
    %16 = arith.cmpi sge, %14, %15 : vector<16x8xi32>
    %c2_i32_7 = arith.constant 2 : i32
    %17 = vector.broadcast %c2_i32_7 : i32 to vector<16x8xi32>
    %18 = arith.cmpi slt, %14, %17 : vector<16x8xi32>
    %19 = arith.andi %16, %18 : vector<16x8xi1>
    %cst_8 = arith.constant 1.000000e+00 : f32
    %cst_9 = arith.constant 0.000000e+00 : f32
    %20 = vector.broadcast %cst_8 : f32 to vector<16x8xf32>
    %21 = vector.broadcast %cst_9 : f32 to vector<16x8xf32>
    %22 = arith.select %19, %20, %21 : vector<16x8xi1>, vector<16x8xf32>
    %cst_10 = arith.constant dense<0.000000e+00> : vector<16x128xf32>
    %23 = tpu.matmul %22, %9, %cst_10 {dimension_numbers = #tpu.dot_dimension_numbers<[1], [0], [0], [1], [0, 0, 1, 1], [], []>} : vector<16x8xf32>, vector<8x128xf32>, vector<16x128xf32> -> vector<16x128xf32>
    %cst_11 = arith.constant 11.3137083 : f32
    %24 = vector.broadcast %cst_11 : f32 to vector<16x128xf32>
    %25 = arith.mulf %8, %24 : vector<16x128xf32>
    %26 = arith.addf %25, %23 : vector<16x128xf32>
    %c0_12 = arith.constant 0 : index
    %c0_13 = arith.constant 0 : index
    %27 = vector.load %arg4[%c0_12, %c0_13] : memref<16x128xf32, #tpu.memory_space<vmem>>, vector<16x128xf32>
    tpu.vector_store %arg4[%c0_12, %c0_13], %26 {strides = array<i32>} : memref<16x128xf32, #tpu.memory_space<vmem>>, vector<16x128xf32>,
    return
  }
  func.func @transform_0(%arg0: i32) -> (i32, i32) {
    %c0_i32 = arith.constant 0 : i32
    %c0_i32_0 = arith.constant 0 : i32
    return %arg0, %c0_i32 : i32, i32
  }
  func.func @transform_1(%arg0: i32) -> (i32, i32) {
    %c0_i32 = arith.constant 0 : i32
    %c0_i32_0 = arith.constant 0 : i32
    %c0_i32_1 = arith.constant 0 : i32
    return %c0_i32, %c0_i32_0 : i32, i32
  }
  func.func @transform_2(%arg0: i32) -> (i32, i32) {
    %c0_i32 = arith.constant 0 : i32
    %c0_i32_0 = arith.constant 0 : i32
    return %arg0, %c0_i32 : i32, i32
  }
  func.func @transform_3(%arg0: i32) -> (i32, i32) {
    %c0_i32 = arith.constant 0 : i32
    %c0_i32_0 = arith.constant 0 : i32
    return %arg0, %c0_i32 : i32, i32
  }
}

</mosaic_0001>

<bundles_post_ra>
// kernel: tpu_custom_call.1
= control target key start
LH: loop header
LB: loop body
LE: loop exit
PB: predicated region body
PF: predicated region fallthrough
CT: control target
= control target key end

     0   :  { %8 = vsyncpa [#allocation3], 0  ;;  %s1591_s0 = inlined_call_operand.vmem [shape: s32[32,1], index: 0, kind: input, shape index: {}]   ;;  %s1592_s1 = inlined_call_operand.hbm [shape: f32[1024,128], index: 1, kind: input, shape index: {}]   ;;  %s1593_s2 = inlined_call_operand.vmem [shape: f32[16,128], index: 2, kind: input, shape index: {}]   ;;  %s1594_s3 = inlined_call_operand.hbm [shape: f32[32,128], index: 3, kind: output, shape index: {}]  }
   0x1   :  { %9 = vsyncpa [#allocation4], 0 }
   0x2   :  { %11 = vsyncpa [#allocation4 + $0x1], 0  ;;  %s1389_s12 = smov 0   ;;  %s1391_s13 = smov 0  }
   0x3   :  { %s1393_s14 = smov 0   ;;  %s1395_s15 = smov 0  }
   0x4 LB: > { %s1410_s16 = sadd.s32 4294967295, %s1358_s15   ;;  %s884_s17 = sadd.s32 4294967294, %s1358_s15   ;;  %s1358_s15 = sphi %s1395_s15, %s1610_s15   ;;  %s1354_s14 = sphi %s1393_s14, %s1609_s14   ;;  %s1350_s13 = sphi %s1391_s13, %s1608_s13   ;;  %s1346_s12 = sphi %s1389_s12, %s1607_s12  }
   0x5   : > { %s1414_s18 = sadd.s32 1, %s1358_s15   ;;  %s97_s19 = sadd.s32 1, %s1354_s14 }
   0x6   : > { %s94_s20 = ssub.s32 %s1358_s15, %s1414_s18  ;;  %p107_p0 = scmp.ne.s32.totalorder %s1354_s14, %s1350_s13 }
   0x7   : > { %p95_p1 = scmp.eq.s32.totalorder %s94_s20, 0  ;;  %p108_p2 = scmp.eq.s32.totalorder %s1410_s16, 1 }
   0x8   : > { %p113_p3 = scmp.ne.s32.totalorder %s1350_s13, %s1346_s12  ;;  %p114_p4 = scmp.eq.s32.totalorder %s884_s17, 1 }
   0x9   : > { %s1425_s21 = scalar_select %p95_p1, %s1354_s14, %s97_s19  }
   0xa   : > { %p1427_p5 = por %p108_p2, %p107_p0  ;;  %p1431_p6 = por %p114_p4, %p113_p3 }
   0xb   : > { %p885_p7 = scmp.ge.s32.totalorder %s1358_s15, 1  ;;  %p121_p8 = scmp.lt.s32.totalorder %s1358_s15, 3 }
   0xc   : > { %s1598_s22 = scalar_select %p1427_p5, 1, 0 }
   0xd   : > { %s1599_s23 = scalar_select %p1431_p6, 1, 0 }
   0xe   : > { %p1595_p9 = scmp.eq.s32.totalorder %s1410_s16, 0  ;;  %p1438_p10 = pnand %p885_p7, %p121_p8 }
   0xf   : > { %s1360_s25 = smov [#allocation2]   ;;  %s1264_s30 = scalar_lea.hbm %s1592_s1, 16384 }
  0x10   : > { %s1600_s24 = scalar_select %p1438_p10, 1, 0 }
  0x11   : > { %s133_s26 = sshll.u32 %s1360_s25, 4  ;;  %p1212_p11 = pneg %p1438_p10  ;;  %s134_s26 = int_to_ptr.vmem [resolvable:$true] %s133_s26 }
  0x12   : > { %p1265_p13 = scmp.ne.s32.totalorder %s1592_s1, %s1264_s30  ;;  %p1271_p3 = scmp.lt.u32.totalorder %s1264_s30, %s1592_s1 }
  0x13   : > { %p1446_p12 = pnand %p1595_p9, %p1212_p11 }
  0x15   : > { %p1266_p0 = pneg %p1446_p12 }
  0x17   : > { %p1267_p1 = pnand %p1266_p0, %p1265_p13 }
  0x19   : > { %p1268_p2 = pneg %p1267_p1 }
  0x1b   : > { %p1273_p4 = pnand %p1271_p3, %p1268_p2 }
  0x1d   : > { %1276 = shalt.err (!%p1273_p4)
}
  0x1e   : > { %s1277_s8 = scalar_lea.vmem %s134_s26, 16384  ;;  %p1285_p9 = scmp.lt.s32.totalorder %s134_s26, %s134_s26 }
  0x1f   : > { %p1278_p7 = scmp.ne.s32.totalorder %s134_s26, %s1277_s8  ;;  %p1286_p6 = scmp.lt.s32.totalorder %s1277_s8, %s1277_s8 }
  0x21   : > { %p1280_p8 = pnand %p1278_p7, %p1266_p0  ;;  %p1287_p5 = por %p1286_p6, %p1285_p9 }
  0x23   : > { %p1281_p11 = pneg %p1280_p8 }
  0x25   : > { %p1288_p10 = pnand %p1287_p5, %p1281_p11 }
  0x27   : > { %1291 = shalt.err (!%p1288_p10)
}
  0x28   : > { %s1361_s9 = smov 128   ;;  %s1362_s10 = smov 8  }
  0x29   : > { %1215 = dma.hbm_to_vmem [thread:$0]  (!%p1446_p12), %s1592_s1, 16384, %s134_s26, [#allocation3], %s1361_s9, %s1361_s9, %s1362_s10  }
  0x2a   : > { %p1602_p13 = scmp.ne.s32.totalorder %s1600_s24, 0 }
  0x2b   : > { %p1603_p1 = scmp.eq.s32.totalorder (!%p1602_p13), %s1410_s16, 0 }
  0x2c   : > { %165 = sbr.rel (%p1602_p13) target bundleno = 463 (0x1cf), region = 32 }
  0x33   : > { %1337 = dma.done.wait (%p1603_p1), [#allocation3], 16384   ;;  %p1604_p0 = pmov %p1603_p1 }
  0x34   : > { %s891_s19 = sshll.u32 %s1410_s16, 1  ;;  %v1363_v0 = vmov 0   ;;  %v269_v3 = vld [vmem:[#allocation2 + $0x80] sm:$0xff]  ;;  %v270_v4 = vld [vmem:[#allocation2 + $0x88] sm:$0xff]  ;;  %v271_v14 = vld [vmem:[#allocation2 + $0x90] sm:$0xff]  ;;  %p199_p6 = scmp.lt.s32.totalorder %s1410_s16, 1 }
  0x35   : > { %1339 = vsyncadd (%p1604_p0), [#allocation3], 4294950912  ;;  %1263 = vset.pattern.permute.xlu0 %v1363_v0  ;;  %p194_p5 = scmp.lt.s32.totalorder %s891_s19, 3  ;;  %v301_v5 = vld [vmem:[#allocation2 + $0x180] sm:$0xff]  ;;  %v302_v6 = vld [vmem:[#allocation2 + $0x188] sm:$0xff]  ;;  %v1078_v7 = vpack.c.bf16 %v270_v4, %v269_v3  ;;  %s190_s5 = sand.u32 1, %s1350_s13  }
  0x36   : > { %v1110_v8 = vpack.c.bf16 %v302_v6, %v301_v5  ;;  %v253_v9 = vld [vmem:[#allocation2] sm:$0xff]  ;;  %v254_v10 = vld [vmem:[#allocation2 + $0x8] sm:$0xff]  ;;  %v272_v15 = vld [vmem:[#allocation2 + $0x98] sm:$0xff]  ;;  %s200_s24 = scalar_select %p199_p6, %s1410_s16, 1 }
  0x37   : > { %s1612_s19 = smov (!%p194_p5, %s891_s19), 3  ;;  %v285_v11 = vld [vmem:[#allocation2 + $0x100] sm:$0xff]  ;;  %v1080_v12 = vpack.c.bf16 %v254_v10, %v253_v9  ;;  %v286_v13 = vld [vmem:[#allocation2 + $0x108] sm:$0xff]  ;;  %1079 = vmatprep.subr.bf16.mxu0 %v1078_v7  ;;  %v1082_v17 = vpack.c.bf16 %v272_v15, %v271_v14  ;;  %v303_v18 = vld [vmem:[#allocation2 + $0x190] sm:$0xff]  ;;  %s890_s6 = sshll.u32 %s190_s5, 4 }
  0x38   : > { %s892_s20 = sshll.u32 %s1612_s19, 3  ;;  %1111 = vmatprep.subr.bf16.mxu1 %v1110_v8  ;;  %v1112_v16 = vpack.c.bf16 %v286_v13, %v285_v11  ;;  %v304_v19 = vld [vmem:[#allocation2 + $0x198] sm:$0xff]  ;;  %v255_v20 = vld [vmem:[#allocation2 + $0x10] sm:$0xff]  ;;  %v273_v27 = vld [vmem:[#allocation2 + $0xa0] sm:$0xff]  ;;  %s893_s28 = sshll.u32 %s200_s24, 3 }
  0x39   : > { %s197_s26 = scalar_lea.vmem %s1591_s0, %s892_s20  ;;  %1081 = vmatpush3.bf16.msra.mxu0 %v1080_v12  ;;  %v1114_v21 = vpack.c.bf16 %v304_v19, %v303_v18  ;;  %v256_v22 = vld [vmem:[#allocation2 + $0x18] sm:$0xff]  ;;  %v287_v23 = vld [vmem:[#allocation2 + $0x110] sm:$0xff]  ;;  %v274_v28 = vld [vmem:[#allocation2 + $0xa8] sm:$0xff]  ;;  %s202_s4 = scalar_lea.vmem %s1593_s2, %s893_s28 }
  0x3a   : > { %v204_v1 = vld [vmem:[%s197_s26] sm:$0xff]  ;;  %v205_v2 = vld [vmem:[%s197_s26 + $0x8] sm:$0xff]  ;;  %1113 = vmatpush3.bf16.msra.mxu1 %v1112_v16  ;;  %1083 = vmatprep.subr.bf16.mxu0 %v1082_v17  ;;  %v1084_v25 = vpack.c.bf16 %v256_v22, %v255_v20  ;;  %v305_v29 = vld [vmem:[#allocation2 + $0x1a0] sm:$0xff]  ;;  %v1086_v30 = vpack.c.bf16 %v274_v28, %v273_v27  ;;  %s192_s7 = scalar_lea.vmem [#allocation5], %s890_s6  ;;  %s917_s9 = sshll.u32 %s1410_s16, 8 }
  0x3b   : > { %216 = vperm.xlu0 %1263, %v204_v1   ;;  %v288_v24 = vld [vmem:[#allocation2 + $0x118] sm:$0xff]  ;;  %1115 = vmatprep.subr.bf16.mxu1 %v1114_v21  ;;  %v306_v31 = vld [vmem:[#allocation2 + $0x1a8] sm:$0xff]  ;;  %v257_v32 = vld [vmem:[#allocation2 + $0x20] sm:$0xff]  ;;  %s798_s8 = sshll.u32 %s192_s7, 4  ;;  %s1548_s17 = scalar_lea.hbm %s1594_s3, %s917_s9  ;;  %s1543_s8 = int_to_ptr.vmem [resolvable:$true] %s798_s8 }
  0x3c   : > { %v1116_v26 = vpack.c.bf16 %v288_v24, %v287_v23  ;;  %v258_v33 = vld [vmem:[#allocation2 + $0x28] sm:$0xff]  ;;  %v1118_v34 = vpack.c.bf16 %v306_v31, %v305_v29  ;;  %v289_v35 = vld [vmem:[#allocation2 + $0x120] sm:$0xff]  ;;  %v275_v37 = vld [vmem:[#allocation2 + $0xb0] sm:$0xff]  ;;  %s1550_s19 = scalar_lea.sflag [#allocation4], %s190_s5  ;;  %s1292_s20 = scalar_lea.vmem %s1543_s8, 256 }
  0x3d   : > { %v290_v36 = vld [vmem:[#allocation2 + $0x128] sm:$0xff]  ;;  %1085 = vmatpush3.bf16.msra.mxu0 %v1084_v25  ;;  %v1088_v38 = vpack.c.bf16 %v258_v33, %v257_v32  ;;  %v276_v39 = vld [vmem:[#allocation2 + $0xb8] sm:$0xff]  ;;  %v307_v40 = vld [vmem:[#allocation2 + $0x1b0] sm:$0xff]  ;;  %p1293_p9 = scmp.ne.s32.totalorder %s1543_s8, %s1292_s20  ;;  %p1605_p10 = scmp.ne.s32.totalorder %s1598_s22, 0 }
  0x3e   : > { %v308_v41 = vld [vmem:[#allocation2 + $0x1b8] sm:$0xff]  ;;  %1117 = vmatpush3.bf16.msra.mxu1 %v1116_v26  ;;  %1087 = vmatprep.subr.bf16.mxu0 %v1086_v30  ;;  %v1120_v42 = vpack.c.bf16 %v290_v36, %v289_v35  ;;  %v1090_v43 = vpack.c.bf16 %v276_v39, %v275_v37  ;;  %v259_v44 = vld [vmem:[#allocation2 + $0x30] sm:$0xff]  ;;  %v277_v49 = vld [vmem:[#allocation2 + $0xc0] sm:$0xff]  ;;  %s1366_s16 = smov [#allocation5]  }
  0x3f   : > { %219 = vperm.xlu0 %1263, %v205_v2   ;;  %v260_v45 = vld [vmem:[#allocation2 + $0x38] sm:$0xff]  ;;  %v291_v46 = vld [vmem:[#allocation2 + $0x130] sm:$0xff]  ;;  %1119 = vmatprep.subr.bf16.mxu1 %v1118_v34  ;;  %v1122_v47 = vpack.c.bf16 %v308_v41, %v307_v40  ;;  %v278_v50 = vld [vmem:[#allocation2 + $0xc8] sm:$0xff]  ;;  %v206_v41 = vlaneseq  ;;  %p1294_p12 = pnand %p1293_p9, %p1605_p10  ;;  %s1296_s25 = sshll.u32 %s1366_s16, 4  ;;  %s1297_s25 = int_to_ptr.vmem [resolvable:$false] %s1296_s25 }
  0x40   : > { %v292_v48 = vld [vmem:[#allocation2 + $0x138] sm:$0xff]  ;;  %v309_v51 = vld [vmem:[#allocation2 + $0x1c0] sm:$0xff]  ;;  %v310_v52 = vld [vmem:[#allocation2 + $0x1c8] sm:$0xff]  ;;  %v1092_v53 = vpack.c.bf16 %v260_v45, %v259_v44  ;;  %v1094_v55 = vpack.c.bf16 %v278_v50, %v277_v49  ;;  %s1298_s27 = scalar_lea.vmem %s1297_s25, 512  ;;  %p1299_p3 = scmp.lt.s32.totalorder %s1543_s8, %s1297_s25 }
  0x41   : > { %1089 = vmatpush3.bf16.msra.mxu0 %v1088_v38  ;;  %v1124_v54 = vpack.c.bf16 %v292_v48, %v291_v46  ;;  %v261_v56 = vld [vmem:[#allocation2 + $0x40] sm:$0xff]  ;;  %v262_v57 = vld [vmem:[#allocation2 + $0x48] sm:$0xff]  ;;  %v1126_v59 = vpack.c.bf16 %v310_v52, %v309_v51  ;;  %v279_v61 = vld [vmem:[#allocation2 + $0xd0] sm:$0xff]  ;;  %p1295_p2 = pneg %p1294_p12  ;;  %p1300_p4 = scmp.lt.s32.totalorder %s1298_s27, %s1292_s20 }
  0x42   : > { %1121 = vmatpush3.bf16.msra.mxu1 %v1120_v42  ;;  %1091 = vmatprep.subr.bf16.mxu0 %v1090_v43  ;;  %v293_v58 = vld [vmem:[#allocation2 + $0x140] sm:$0xff]  ;;  %v294_v60 = vld [vmem:[#allocation2 + $0x148] sm:$0xff]  ;;  %v280_v62 = vld [vmem:[#allocation2 + $0xd8] sm:$0xff]  ;;  %v1096_v1 = vpack.c.bf16 %v262_v57, %v261_v56  ;;  %v1477_v42 = vand.u32 127, %v206_v41 }
  0x43   : > { %1123 = vmatprep.subr.bf16.mxu1 %v1122_v47  ;;  %v311_v63 = vld [vmem:[#allocation2 + $0x1d0] sm:$0xff]  ;;  %v312_v0 = vld [vmem:[#allocation2 + $0x1d8] sm:$0xff]  ;;  %v1128_v2 = vpack.c.bf16 %v294_v60, %v293_v58  ;;  %v1098_v3 = vpack.c.bf16 %v280_v62, %v279_v61  ;;  %v281_v9 = vld [vmem:[#allocation2 + $0xe0] sm:$0xff]  ;;  %p1301_p7 = por %p1300_p4, %p1299_p3 }
  0x44   : > { %v263_v4 = vld [vmem:[#allocation2 + $0x50] sm:$0xff]  ;;  %v264_v5 = vld [vmem:[#allocation2 + $0x58] sm:$0xff]  ;;  %v1130_v7 = vpack.c.bf16 %v312_v0, %v311_v63  ;;  %v282_v10 = vld [vmem:[#allocation2 + $0xe8] sm:$0xff]  ;;  %v208_v48 = vadd.s32 128, %v1477_v42  ;;  %v210_v49 = vadd.s32 384, %v1477_v42  ;;  %v209_v50 = vadd.s32 256, %v1477_v42 }
  0x45   : > { %1093 = vmatpush3.bf16.msra.mxu0 %v1092_v53  ;;  %v295_v6 = vld [vmem:[#allocation2 + $0x150] sm:$0xff]  ;;  %v296_v8 = vld [vmem:[#allocation2 + $0x158] sm:$0xff]  ;;  %v313_v11 = vld [vmem:[#allocation2 + $0x1e0] sm:$0xff]  ;;  %v1100_v13 = vpack.c.bf16 %v264_v5, %v263_v4  ;;  %v1102_v15 = vpack.c.bf16 %v282_v10, %v281_v9  ;;  %v1364_v63 = vmov 1.0   ;;  %p1302_p8 = pnand %p1301_p7, %p1295_p2 }
  0x46   : > { %1125 = vmatpush3.bf16.msra.mxu1 %v1124_v54  ;;  %1095 = vmatprep.subr.bf16.mxu0 %v1094_v55  ;;  %v314_v12 = vld [vmem:[#allocation2 + $0x1e8] sm:$0xff]  ;;  %v1132_v14 = vpack.c.bf16 %v296_v8, %v295_v6  ;;  %v265_v16 = vld [vmem:[#allocation2 + $0x60] sm:$0xff]  ;;  %v283_v21 = vld [vmem:[#allocation2 + $0xf0] sm:$0xff]  ;;  %v1499_v8 = vadd.s32 896, %v1477_v42 }
  0x47   : > { %1127 = vmatprep.subr.bf16.mxu1 %v1126_v59  ;;  %v266_v17 = vld [vmem:[#allocation2 + $0x68] sm:$0xff]  ;;  %v297_v18 = vld [vmem:[#allocation2 + $0x160] sm:$0xff]  ;;  %v1134_v19 = vpack.c.bf16 %v314_v12, %v313_v11  ;;  %v284_v22 = vld [vmem:[#allocation2 + $0xf8] sm:$0xff] }
  0x48   : > { %v298_v20 = vld [vmem:[#allocation2 + $0x168] sm:$0xff]  ;;  %v315_v23 = vld [vmem:[#allocation2 + $0x1f0] sm:$0xff]  ;;  %v316_v24 = vld [vmem:[#allocation2 + $0x1f8] sm:$0xff]  ;;  %v1104_v25 = vpack.c.bf16 %v266_v17, %v265_v16  ;;  %v1106_v27 = vpack.c.bf16 %v284_v22, %v283_v21 }
  0x49   : > { %1097 = vmatpush3.bf16.msra.mxu0 %v1096_v1  ;;  %v1136_v26 = vpack.c.bf16 %v298_v20, %v297_v18  ;;  %v267_v28 = vld [vmem:[#allocation2 + $0x70] sm:$0xff]  ;;  %v268_v29 = vld [vmem:[#allocation2 + $0x78] sm:$0xff]  ;;  %v1138_v31 = vpack.c.bf16 %v316_v24, %v315_v23  ;;  %v333_v33 = vld [vmem:[#allocation2 + $0x280] sm:$0xff] }
  0x4a   : > { %1129 = vmatpush3.bf16.msra.mxu1 %v1128_v2  ;;  %1099 = vmatprep.subr.bf16.mxu0 %v1098_v3  ;;  %v299_v30 = vld [vmem:[#allocation2 + $0x170] sm:$0xff]  ;;  %v300_v32 = vld [vmem:[#allocation2 + $0x178] sm:$0xff]  ;;  %v334_v34 = vld [vmem:[#allocation2 + $0x288] sm:$0xff]  ;;  %v1108_v37 = vpack.c.bf16 %v268_v29, %v267_v28 }
  0x4b   : > { %1131 = vmatprep.subr.bf16.mxu1 %v1130_v7  ;;  %v365_v35 = vld [vmem:[#allocation2 + $0x380] sm:$0xff]  ;;  %v366_v36 = vld [vmem:[#allocation2 + $0x388] sm:$0xff]  ;;  %v1140_v38 = vpack.c.bf16 %v300_v32, %v299_v30  ;;  %v1142_v39 = vpack.c.bf16 %v334_v34, %v333_v33  ;;  %v335_v47 = vld [vmem:[#allocation2 + $0x290] sm:$0xff]  ;;  %v1496_v7 = vadd.s32 640, %v1477_v42 }
  0x4c   : > { %v1174_v40 = vpack.c.bf16 %v366_v36, %v365_v35  ;;  %v317_v43 = vld [vmem:[#allocation2 + $0x200] sm:$0xff]  ;;  %v318_v44 = vld [vmem:[#allocation2 + $0x208] sm:$0xff]  ;;  %v336_v51 = vld [vmem:[#allocation2 + $0x298] sm:$0xff] }
  0x4d   : > { %1101 = vmatpush3.bf16.msra.mxu0 %v1100_v13  ;;  %v349_v45 = vld [vmem:[#allocation2 + $0x300] sm:$0xff]  ;;  %v350_v46 = vld [vmem:[#allocation2 + $0x308] sm:$0xff]  ;;  %v367_v52 = vld [vmem:[#allocation2 + $0x390] sm:$0xff]  ;;  %v1144_v55 = vpack.c.bf16 %v318_v44, %v317_v43  ;;  %v1146_v57 = vpack.c.bf16 %v336_v51, %v335_v47 }
  0x4e   : > { %1133 = vmatpush3.bf16.msra.mxu1 %v1132_v14  ;;  %1103 = vmatprep.subr.bf16.mxu0 %v1102_v15  ;;  %v368_v53 = vld [vmem:[#allocation2 + $0x398] sm:$0xff]  ;;  %v1176_v56 = vpack.c.bf16 %v350_v46, %v349_v45  ;;  %v319_v59 = vld [vmem:[#allocation2 + $0x210] sm:$0xff]  ;;  %v337_v0 = vld [vmem:[#allocation2 + $0x2a0] sm:$0xff] }
  0x4f   : > { %1135 = vmatprep.subr.bf16.mxu1 %v1134_v19  ;;  %v1178_v58 = vpack.c.bf16 %v368_v53, %v367_v52  ;;  %v320_v60 = vld [vmem:[#allocation2 + $0x218] sm:$0xff]  ;;  %v351_v61 = vld [vmem:[#allocation2 + $0x310] sm:$0xff]  ;;  %v338_v1 = vld [vmem:[#allocation2 + $0x2a8] sm:$0xff] }
  0x50   : > { %v352_v62 = vld [vmem:[#allocation2 + $0x318] sm:$0xff]  ;;  %v369_v2 = vld [vmem:[#allocation2 + $0x3a0] sm:$0xff]  ;;  %v370_v3 = vld [vmem:[#allocation2 + $0x3a8] sm:$0xff]  ;;  %v1148_v5 = vpack.c.bf16 %v320_v60, %v319_v59  ;;  %v1150_v14 = vpack.c.bf16 %v338_v1, %v337_v0 }
  0x51   : > { %1105 = vmatpush3.bf16.msra.mxu0 %v1104_v25  ;;  %v1180_v6 = vpack.c.bf16 %v352_v62, %v351_v61  ;;  %v321_v9 = vld [vmem:[#allocation2 + $0x220] sm:$0xff]  ;;  %v322_v10 = vld [vmem:[#allocation2 + $0x228] sm:$0xff]  ;;  %v339_v13 = vld [vmem:[#allocation2 + $0x2b0] sm:$0xff]  ;;  %v1182_v15 = vpack.c.bf16 %v370_v3, %v369_v2 }
  0x52   : > { %1137 = vmatpush3.bf16.msra.mxu1 %v1136_v26  ;;  %1107 = vmatprep.subr.bf16.mxu0 %v1106_v27  ;;  %v353_v11 = vld [vmem:[#allocation2 + $0x320] sm:$0xff]  ;;  %v354_v12 = vld [vmem:[#allocation2 + $0x328] sm:$0xff]  ;;  %v340_v16 = vld [vmem:[#allocation2 + $0x2b8] sm:$0xff]  ;;  %v1152_v19 = vpack.c.bf16 %v322_v10, %v321_v9  ;;  %v683_v10 = vshrl.u32 %v206_v41, 7 }
  0x53   : > { %1139 = vmatprep.subr.bf16.mxu1 %v1138_v31  ;;  %v371_v17 = vld [vmem:[#allocation2 + $0x3b0] sm:$0xff]  ;;  %v372_v18 = vld [vmem:[#allocation2 + $0x3b8] sm:$0xff]  ;;  %v1184_v20 = vpack.c.bf16 %v354_v12, %v353_v11  ;;  %v1154_v23 = vpack.c.bf16 %v340_v16, %v339_v13  ;;  %v341_v27 = vld [vmem:[#allocation2 + $0x2c0] sm:$0xff]  ;;  %v685_v11 = vmul.u32 2, %v1477_v42 }
  0x54   : > { %v323_v21 = vld [vmem:[#allocation2 + $0x230] sm:$0xff]  ;;  %v324_v22 = vld [vmem:[#allocation2 + $0x238] sm:$0xff]  ;;  %v1186_v24 = vpack.c.bf16 %v372_v18, %v371_v17  ;;  %v342_v28 = vld [vmem:[#allocation2 + $0x2c8] sm:$0xff] }
  0x55   : > { %1109 = vmatpush3.bf16.msra.mxu0 %v1108_v37  ;;  %v355_v25 = vld [vmem:[#allocation2 + $0x330] sm:$0xff]  ;;  %v356_v26 = vld [vmem:[#allocation2 + $0x338] sm:$0xff]  ;;  %v373_v29 = vld [vmem:[#allocation2 + $0x3c0] sm:$0xff]  ;;  %v1156_v31 = vpack.c.bf16 %v324_v22, %v323_v21  ;;  %v1158_v35 = vpack.c.bf16 %v342_v28, %v341_v27  ;;  %v686_v41 = vsub.s32 %v683_v10, %v685_v11 }
  0x56   : > { %1141 = vmatpush3.bf16.msra.mxu1 %v1140_v38  ;;  %1143 = vmatprep.subr.bf16.mxu0 %v1142_v39  ;;  %v374_v30 = vld [vmem:[#allocation2 + $0x3c8] sm:$0xff]  ;;  %v1188_v32 = vpack.c.bf16 %v356_v26, %v355_v25  ;;  %v325_v33 = vld [vmem:[#allocation2 + $0x240] sm:$0xff]  ;;  %v343_v39 = vld [vmem:[#allocation2 + $0x2d0] sm:$0xff] }
  0x57   : > { %1175 = vmatprep.subr.bf16.mxu1 %v1174_v40  ;;  %v326_v34 = vld [vmem:[#allocation2 + $0x248] sm:$0xff]  ;;  %v1190_v36 = vpack.c.bf16 %v374_v30, %v373_v29  ;;  %v357_v37 = vld [vmem:[#allocation2 + $0x340] sm:$0xff]  ;;  %v344_v40 = vld [vmem:[#allocation2 + $0x2d8] sm:$0xff]  ;;  %vm688_vm10 = vcmp.ge.s32.totalorder %v686_v41, 0  ;;  %vm690_vm11 = vcmp.lt.s32.totalorder %v686_v41, 2 }
  0x58   : > { %v358_v38 = vld [vmem:[#allocation2 + $0x348] sm:$0xff]  ;;  %v375_v43 = vld [vmem:[#allocation2 + $0x3d0] sm:$0xff]  ;;  %v376_v44 = vld [vmem:[#allocation2 + $0x3d8] sm:$0xff]  ;;  %v1160_v45 = vpack.c.bf16 %v326_v34, %v325_v33 }
  0x59   : > { %v1192_v46 = vpack.c.bf16 %v358_v38, %v357_v37  ;;  %v327_v47 = vld [vmem:[#allocation2 + $0x250] sm:$0xff]  ;;  %v360_v52 = vld [vmem:[#allocation2 + $0x358] sm:$0xff]  ;;  %v345_v53 = vld [vmem:[#allocation2 + $0x2e0] sm:$0xff] }
  0x5a   : > { %v359_v51 = vld [vmem:[#allocation2 + $0x350] sm:$0xff]  ;;  %v329_v60 = vld [vmem:[#allocation2 + $0x260] sm:$0xff]  ;;  %v330_v61 = vld [vmem:[#allocation2 + $0x268] sm:$0xff] }
  0x5b   : > { %v1196_v59 = vpack.c.bf16 %v360_v52, %v359_v51  ;;  %v361_v1 = vld [vmem:[#allocation2 + $0x360] sm:$0xff]  ;;  %v362_v2 = vld [vmem:[#allocation2 + $0x368] sm:$0xff]  ;;  %v347_v3 = vld [vmem:[#allocation2 + $0x2f0] sm:$0xff]  ;;  %v1168_v12 = vpack.c.bf16 %v330_v61, %v329_v60 }
  0x5c   : > { %v380_v9 = vld [vmem:[#allocation2 + $0x3f8] sm:$0xff]  ;;  %v1200_v13 = vpack.c.bf16 %v362_v2, %v361_v1  ;;  %v363_v18 = vld [vmem:[#allocation2 + $0x370] sm:$0xff] }
  0x5d   : > { %v332_v17 = vld [vmem:[#allocation2 + $0x278] sm:$0xff]  ;;  %v681_v25 = vld [vmem:[%s202_s4] sm:$0xff] }
  0xba   : > { %v1482_v54 = vpop.permute.xlu0 %216 }
  0xbb   : > { %vm222_vm0 = vcmp.eq.s32.totalorder %v1482_v54, %v208_v48  ;;  %vm224_vm1 = vcmp.eq.s32.totalorder %v1482_v54, %v210_v49  ;;  %vm221_vm2 = vcmp.eq.s32.totalorder %v1482_v54, %v1477_v42  ;;  %vm223_vm3 = vcmp.eq.s32.totalorder %v1482_v54, %v209_v50 }
  0xbc   : > { %894 = vmatprep.mubr.msk.f32.mxu0 %vm222_vm0, %v1364_v63  ;;  %898 = vmatprep.mubr.msk.f32.mxu1 %vm224_vm1, %v1364_v63  ;;  %vm226_vm8 = vcmp.eq.s32.totalorder %v1482_v54, %v1496_v7  ;;  %vm228_vm9 = vcmp.eq.s32.totalorder %v1482_v54, %v1499_v8  ;;  %vm692_vm0 = vmand %vm688_vm10, %vm690_vm11 }
  0xbd   : > { %895 = vmatmul.mubr.msk.f32.vlgmr.msra.gmra.mrb[0].mxu0 %vm221_vm2, %v1364_v63  ;;  %899 = vmatmul.mubr.msk.f32.vlgmr.msra.gmra.mrb[0].mxu1 %vm223_vm3, %v1364_v63 }
  0xbe   : > { %1145 = vmatpush3.bf16.msra.mxu0 %v1144_v55  ;;  %1177 = vmatpush3.bf16.msra.mxu1 %v1176_v56  ;;  %v1493_v4 = vpop.permute.xlu0 %219  ;;  %v346_v55 = vld [vmem:[#allocation2 + $0x2e8] sm:$0xff]  ;;  %v377_v56 = vld [vmem:[#allocation2 + $0x3e0] sm:$0xff] }
  0xbf   : > { %vm230_vm4 = vcmp.eq.s32.totalorder %v1493_v4, %v208_v48  ;;  %vm232_vm5 = vcmp.eq.s32.totalorder %v1493_v4, %v210_v49  ;;  %1147 = vmatprep.subr.bf16.mxu0 %v1146_v57  ;;  %1179 = vmatprep.subr.bf16.mxu1 %v1178_v58  ;;  %vm229_vm6 = vcmp.eq.s32.totalorder %v1493_v4, %v1477_v42  ;;  %v328_v48 = vld [vmem:[#allocation2 + $0x258] sm:$0xff]  ;;  %v378_v57 = vld [vmem:[#allocation2 + $0x3e8] sm:$0xff] }
  0xc0   : > { %896 = vmatprep.mubr.msk.f32.mxu0 %vm230_vm4, %v1364_v63  ;;  %900 = vmatprep.mubr.msk.f32.mxu1 %vm232_vm5, %v1364_v63  ;;  %vm231_vm7 = vcmp.eq.s32.totalorder %v1493_v4, %v209_v50  ;;  %v1162_v49 = vpack.c.bf16 %v344_v40, %v343_v39  ;;  %v1194_v50 = vpack.c.bf16 %v376_v44, %v375_v43  ;;  %vm696_vm4 = vcmask 64512  }
  0xc1   : > { %897 = vmatmul.mubr.msk.f32.gmra.mrb[2].mxu0 %vm229_vm6, %v1364_v63  ;;  %901 = vmatmul.mubr.msk.f32.gmra.mrb[2].mxu1 %vm231_vm7, %v1364_v63  ;;  %v1164_v58 = vpack.c.bf16 %v328_v48, %v327_v47  ;;  %v1166_v62 = vpack.c.bf16 %v346_v55, %v345_v53  ;;  %v1198_v0 = vpack.c.bf16 %v378_v57, %v377_v56 }
  0xc2   : > { %1149 = vmatpush3.bf16.msra.mxu0 %v1148_v5  ;;  %1181 = vmatpush3.bf16.msra.mxu1 %v1180_v6  ;;  %v348_v5 = vld [vmem:[#allocation2 + $0x2f8] sm:$0xff]  ;;  %v379_v6 = vld [vmem:[#allocation2 + $0x3f0] sm:$0xff]  ;;  %vm234_vm1 = vcmp.eq.s32.totalorder %v1493_v4, %v1496_v7  ;;  %vm236_vm2 = vcmp.eq.s32.totalorder %v1493_v4, %v1499_v8 }
  0xc3   : > { %902 = vmatprep.mubr.msk.f32.mxu0 %vm226_vm8, %v1364_v63  ;;  %906 = vmatprep.mubr.msk.f32.mxu1 %vm228_vm9, %v1364_v63  ;;  %v1202_v16 = vpack.c.bf16 %v380_v9, %v379_v6 }
  0xc4   : > { %1151 = vmatprep.subr.bf16.mxu0 %v1150_v14  ;;  %1183 = vmatprep.subr.bf16.mxu1 %v1182_v15  ;;  %v331_v14 = vld [vmem:[#allocation2 + $0x270] sm:$0xff]  ;;  %v1170_v15 = vpack.c.bf16 %v348_v5, %v347_v3 }
  0xc5   : > { %v1172_v21 = vpack.c.bf16 %v332_v17, %v331_v14 }
  0xc6   : > { %1153 = vmatpush3.bf16.msra.mxu0 %v1152_v19  ;;  %1185 = vmatpush3.bf16.msra.mxu1 %v1184_v20  ;;  %v364_v19 = vld [vmem:[#allocation2 + $0x378] sm:$0xff]  ;;  %v684_v20 = vadd.s32 8, %v683_v10 }
  0xc7   : > { %1155 = vmatprep.subr.bf16.mxu0 %v1154_v23  ;;  %1187 = vmatprep.subr.bf16.mxu1 %v1186_v24  ;;  %v1204_v22 = vpack.c.bf16 %v364_v19, %v363_v18  ;;  %v211_v23 = vadd.s32 512, %v1477_v42  ;;  %v213_v24 = vadd.s32 768, %v1477_v42  ;;  %v1365_v42 = vmov 0.0  }
  0xc8   : > { %v687_v26 = vsub.s32 %v684_v20, %v685_v11 }
  0xc9   : > { %vm225_vm12 = vcmp.eq.s32.totalorder %v1482_v54, %v211_v23  ;;  %vm227_vm13 = vcmp.eq.s32.totalorder %v1482_v54, %v213_v24  ;;  %v694_v54 = vsel %vm692_vm0, 1.0, %v1365_v42  ;;  %vm233_vm5 = vcmp.eq.s32.totalorder %v1493_v4, %v211_v23 }
  0xca   : > { %1157 = vmatpush3.bf16.msra.mxu0 %v1156_v31  ;;  %1189 = vmatpush3.bf16.msra.mxu1 %v1188_v32  ;;  %vm689_vm14 = vcmp.ge.s32.totalorder %v687_v26, 0  ;;  %vm691_vm15 = vcmp.lt.s32.totalorder %v687_v26, 2  ;;  %vm235_vm6 = vcmp.eq.s32.totalorder %v1493_v4, %v213_v24 }
  0xcb   : > { %1159 = vmatprep.subr.bf16.mxu0 %v1158_v35  ;;  %1191 = vmatprep.subr.bf16.mxu1 %v1190_v36  ;;  %vm693_vm3 = vmand %vm689_vm14, %vm691_vm15 }
  0xcc   : > { %v695_v7 = vsel %vm693_vm3, 1.0, %v1365_v42 }
  0xce   : > { %1161 = vmatpush3.bf16.msra.mxu0 %v1160_v45  ;;  %1193 = vmatpush3.bf16.msra.mxu1 %v1192_v46 }
  0xcf   : > { %1163 = vmatprep.subr.bf16.mxu0 %v1162_v49  ;;  %1195 = vmatprep.subr.bf16.mxu1 %v1194_v50 }
  0xd2   : > { %1165 = vmatpush3.bf16.msra.mxu0 %v1164_v58  ;;  %1197 = vmatpush3.bf16.msra.mxu1 %v1196_v59 }
  0xd3   : > { %1167 = vmatprep.subr.bf16.mxu0 %v1166_v62  ;;  %1199 = vmatprep.subr.bf16.mxu1 %v1198_v0 }
  0xd6   : > { %1169 = vmatpush3.bf16.msra.mxu0 %v1168_v12  ;;  %1201 = vmatpush3.bf16.msra.mxu1 %v1200_v13 }
  0xd7   : > { %1171 = vmatprep.subr.bf16.mxu0 %v1170_v15  ;;  %1203 = vmatprep.subr.bf16.mxu1 %v1202_v16 }
  0xda   : > { %1173 = vmatpush3.bf16.msra.mxu0 %v1172_v21  ;;  %1205 = vmatpush3.bf16.msra.mxu1 %v1204_v22 }
  0xdb   : > { %1073 = vmatprep.subr.mxu0 %v681_v25 }
  0xdd   : > { %903 = vmatmul.mubr.msk.f32.vlgmr.msra.gmra.mrb[4].mxu0 %vm225_vm12, %v1364_v63  ;;  %907 = vmatmul.mubr.msk.f32.vlgmr.msra.gmra.mrb[4].mxu1 %vm227_vm13, %v1364_v63 }
  0xde   : > { %904 = vmatprep.mubr.msk.f32.mxu0 %vm234_vm1, %v1364_v63  ;;  %908 = vmatprep.mubr.msk.f32.mxu1 %vm236_vm2, %v1364_v63 }
  0xdf   : > { %1074 = vmatpush3.msra.mxu0 %v681_v25 }
  0xe1   : > { %905 = vmatmul.mubr.msk.f32.gmra.mrb[6].mxu0 %vm233_vm5, %v1364_v63  ;;  %909 = vmatmul.mubr.msk.f32.gmra.mrb[6].mxu1 %vm235_vm6, %v1364_v63 }
  0xe2   : > { %1075 = vmatprep.mubr.msk.f32.mxu0 %vm696_vm4, %v694_v54 }
  0xe5   : > { %1076 = vmatmul.mubr.msk.f32.vlgmr.msra.gmra.mrb[8].mxu0 %vm696_vm4, %v695_v7 }
 0x190   : > { %v950_v8 = vpop.f32.mrb[0].mxu0  ;;  %v988_v27 = vpop.f32.mrb[0].mxu1 }
 0x191   : > { %v951_v28 = vpop.f32.mrb[1].mxu0  ;;  %v989_v29 = vpop.f32.mrb[1].mxu1 }
 0x192   : > { %v952_v30 = vadd.f32 %v951_v28, %v950_v8  ;;  %v990_v31 = vadd.f32 %v989_v29, %v988_v27 }
 0x194   : > { %v523_v32 = vadd.f32 %v990_v31, %v952_v30  ;;  %v953_v33 = vpop.f32.mrb[2].mxu0  ;;  %v991_v34 = vpop.f32.mrb[2].mxu1 }
 0x195   : > { %v954_v35 = vpop.f32.mrb[3].mxu0  ;;  %v992_v36 = vpop.f32.mrb[3].mxu1 }
 0x196   : > { %v955_v4 = vadd.f32 %v954_v35, %v953_v33  ;;  %v993_v37 = vadd.f32 %v992_v36, %v991_v34 }
 0x198   : > { %v528_v38 = vadd.f32 %v993_v37, %v955_v4 }
 0x1b0   : > { %v1026_v39 = vpop.f32.mrb[4].mxu0  ;;  %v1064_v63 = vpop.f32.mrb[4].mxu1 }
 0x1b1   : > { %v1027_v40 = vpop.f32.mrb[5].mxu0  ;;  %v1065_v43 = vpop.f32.mrb[5].mxu1 }
 0x1b2   : > { %v1028_v44 = vadd.f32 %v1027_v40, %v1026_v39  ;;  %v1066_v45 = vadd.f32 %v1065_v43, %v1064_v63 }
 0x1b4   : > { %v598_v46 = vadd.f32 %v1028_v44, %v523_v32  ;;  %v1029_v47 = vpop.f32.mrb[6].mxu0  ;;  %v1067_v48 = vpop.f32.mrb[6].mxu1 }
 0x1b5   : > { %v1030_v49 = vpop.f32.mrb[7].mxu0  ;;  %v1068_v50 = vpop.f32.mrb[7].mxu1 }
 0x1b6   : > { %v673_v51 = vadd.f32 %v1066_v45, %v598_v46  ;;  %v1031_v52 = vadd.f32 %v1030_v49, %v1029_v47  ;;  %v1069_v53 = vadd.f32 %v1068_v50, %v1067_v48 }
 0x1b8   : > { %v603_v55 = vadd.f32 %v1031_v52, %v528_v38  ;;  %v1077_v56 = vpop.f32.mrb[8].mxu0  ;;  %v778_v57 = vmul.f32 11.313708, %v673_v51 }
 0x1b9   : > { %v769_v58 = vpop.f32.mrb[9].mxu0 }
 0x1ba   : > { %v678_v59 = vadd.f32 %v1069_v53, %v603_v55  ;;  %v780_v60 = vadd.f32 %v778_v57, %v769_v58 }
 0x1bc   : > { %v779_v61 = vmul.f32 11.313708, %v678_v59  ;;  %782 = vst [vmem:[%s192_s7] sm:$0xff] %v780_v60 }
 0x1be   : > { %v781_v62 = vadd.f32 %v1077_v56, %v779_v61 }
 0x1c0   : > { %783 = vst [vmem:[%s192_s7 + $0x8] sm:$0xff] %v781_v62 }
 0x1c1   : > { %1305 = shalt.err (!%p1302_p8)
}
 0x1c2   : > { %s1306_s26 = scalar_lea.hbm %s1548_s17, 256  ;;  %s1310_s29 = scalar_lea.hbm %s1594_s3, 512 }
 0x1c3   : > { %p1307_p11 = scmp.ne.s32.totalorder %s1548_s17, %s1306_s26  ;;  %p1311_p0 = scmp.lt.u32.totalorder %s1548_s17, %s1594_s3 }
 0x1c4   : > { %p1312_p5 = scmp.lt.u32.totalorder %s1310_s29, %s1306_s26  ;;  %p1314_p9 = scmp.lt.u32.totalorder %s1306_s26, %s1548_s17 }
 0x1c5   : > { %p1308_p13 = pnand %p1307_p11, %p1605_p10 }
 0x1c6   : > { %p1313_p6 = por %p1312_p5, %p1311_p0 }
 0x1c7   : > { %p1309_p1 = pneg %p1308_p13 }
 0x1c8   : > { %p1315_p12 = por %p1314_p9, %p1313_p6 }
 0x1ca   : > { %p1316_p2 = pnand %p1315_p12, %p1309_p1 }
 0x1cc   : > { %1319 = shalt.err (!%p1316_p2)
}
 0x1cd   : > { %s1367_s5 = smov 128   ;;  %s1368_s6 = smov 8  }
 0x1ce   : > { %1210 = dma.vmem_to_hbm [thread:$0]  (%p1605_p10), %s1543_s8, 256, %s1548_s17, %s1550_s19, %s1367_s5, %s1367_s5, %s1368_s6  }
 0x1cf PF: > { %p1222_p3 = scmp.ge.s32.totalorder %s1358_s15, 2  ;;  %s813_s7 = sand.u32 1, %s1346_s12  }
 0x1d0   : > { %p1606_p4 = scmp.ne.s32.totalorder %s1599_s23, 0  ;;  %s814_s9 = scalar_lea.sflag [#allocation4], %s813_s7 }
 0x1d2   : > { %p1217_p7 = pnand %p1222_p3, %p1606_p4 }
 0x1d4   : > { %1341 = dma.done.wait (!%p1217_p7), %s814_s9, 256  }
 0x1d5   : > { %1343 = vsyncadd (!%p1217_p7), %s814_s9, 4294967040  ;;  %p14_p8 = scmp.ge.s32.totalorder %s1414_s18, 4   ;;  %s1607_s12 = smov %s1350_s13 }
 0x1d6   : > { %s1608_s13 = smov %s1354_s14  ;;  %s1609_s14 = smov %s1425_s21 }
 0x1d7   : > { %s1610_s15 = smov %s1414_s18  ;;  %16 = sbr.rel (!%p14_p8) target bundleno = 4 (0x4), region = 75 }
 0x1de   :  { %819 = vsyncpa [#allocation3], 1 }
 0x1df   :  { %821 = vsyncpa [#allocation3 + $0x1], 1 }
 0x1e0   :  { %822 = vsyncpa [#allocation4], 1 }
 0x1e1   :  { %824 = vsyncpa [#allocation4 + $0x1], 1 }

</bundles_post_ra>
